<compile_context>
chip_gen: v7x
topology: tpu7x:2x2x1
jax: 0.10.0
libtpu: 0.0.40
codegen_flags: <defaults>
</compile_context>

<pallas_src>
import numpy as np
import jax
import jax.numpy as jnp
from jax.experimental import pallas as pl
from jax.experimental.pallas import tpu as pltpu

# ----------------------------- configuration -------------------------------
B = 2                 # batch
DEC_IN = 4            # n_vars == c_out
SEQ_LEN = 16
LABEL_LEN = 8
PRED_LEN = 8          # out_len
D_MODEL = 32
DECOMP_K = 5          # decomp_kernel=[5] (small, odd, like default [33])
PATCH_LEN = 4
STRIDE = 2
PATCH_NUM = (SEQ_LEN - PATCH_LEN) // STRIDE + 1 + 1   # +1: padding_patch='end'
HEAD_NF = D_MODEL * PATCH_NUM
BC = B * DEC_IN
EPS = 1e-5            # RevIN eps
F32 = jnp.float32

# packed-operand column layout ------------------------------------------------
# weight slab (SEQ_LEN, SEQ_LEN + 2*PRED_LEN):
#   [:, 0:L]          ma_mat        (banded moving-average matrix)
#   [:, L:L+P]        trend_w       (= ma_mat @ reg_w^T, folded offline)
#   [:, L+P:L+2P]     w_comb        (= wp_fold @ head_w2, folded offline)
W_MT_HI = SEQ_LEN + PRED_LEN          # first matmul uses [:, 0:W_MT_HI]
W_WC_LO = SEQ_LEN + PRED_LEN
W_WC_HI = SEQ_LEN + 2 * PRED_LEN
# per-row constants slab (BC, 2*PRED_LEN + 3):
#   [:, 0:P]     reg_b (broadcast)   [:, P:2P]  b_comb (broadcast)
#   [:, 2P]      revin weight        [:, 2P+1]  revin bias
#   [:, 2P+2]    1 / (revin weight + eps^2)
C_REG_LO, C_REG_HI = 0, PRED_LEN
C_BC_LO, C_BC_HI = PRED_LEN, 2 * PRED_LEN
C_RW = 2 * PRED_LEN
C_RB = 2 * PRED_LEN + 1
C_RINV = 2 * PRED_LEN + 2
C_WIDTH = 2 * PRED_LEN + 3


# ------------------------------ fused kernel --------------------------------
def micn_fused_kernel(x_ref, w_ref, c_ref, out_ref):
    """Full MICN forward; every row is one (batch, channel) series."""
    x = x_ref[...]                                            # (BC, L)

    # --- series_decomp_multi + trend regression in ONE MXU pass -------------
    # x @ [ma_mat | trend_w]; edge-replicated moving average is a banded (L,L)
    # matrix, trend regression is pre-folded through it (trend_w = ma @ reg^T).
    mt = jnp.dot(x, w_ref[:, 0:W_MT_HI],
                 preferred_element_type=jnp.float32)          # (BC, L+PRED)
    ma = mt[:, 0:SEQ_LEN]
    trend = mt[:, SEQ_LEN:W_MT_HI] + c_ref[:, C_REG_LO:C_REG_HI]
    seasonal = x - ma

    # --- RevIN 'norm' (subtract_last=True, affine=True) ---------------------
    last = seasonal[:, SEQ_LEN - 1:SEQ_LEN]                   # (BC, 1)
    mean = jnp.mean(seasonal, axis=1, keepdims=True)
    var = jnp.mean((seasonal - mean) ** 2, axis=1, keepdims=True)  # unbiased=False
    inv_std = jax.lax.rsqrt(var + EPS)                        # EUP, no vdiv
    std = (var + EPS) * inv_std                               # == sqrt(var+eps)
    rw = c_ref[:, C_RW:C_RW + 1]
    rb = c_ref[:, C_RB:C_RB + 1]
    rinv = c_ref[:, C_RINV:C_RINV + 1]                        # 1/(rw + eps^2)
    y = (seasonal - last) * inv_std * rw + rb                 # (BC, L)

    # --- ReplicationPad1d + unfold + W_P + W_pos + (identity encoder)
    #     + Flatten_Head, all folded offline into one (L, PRED) matmul --------
    # TODO(synk): Seasonal_Prediction encoder not provided in the reference
    # source; identity pass-through assumed (dropout is an inference identity).
    z = (jnp.dot(y, w_ref[:, W_WC_LO:W_WC_HI],
                 preferred_element_type=jnp.float32)
         + c_ref[:, C_BC_LO:C_BC_HI])                         # (BC, PRED)

    # --- RevIN 'denorm' + trend residual -------------------------------------
    z = (z - rb) * rinv                                       # multiply, no vdiv
    out_ref[...] = z * std + last + trend


# --------------------------- parameter packing -------------------------------
def prepare_params(raw):
    """Pack PyTorch-convention parameters into 2 kernel-friendly slabs."""
    pad = (DECOMP_K - 1) // 2

    # moving average with replicate padding as a banded (L, L) matrix
    ma_mat = np.zeros((SEQ_LEN, SEQ_LEN), np.float32)
    for t in range(SEQ_LEN):
        for s in range(-pad, pad + 1):
            src = min(max(t + s, 0), SEQ_LEN - 1)
            ma_mat[src, t] += 1.0 / DECOMP_K

    # regression Linear(seq_len, out_len): weight (out_len, seq_len), bias (out_len,)
    reg_wT = np.asarray(raw["reg_w"], np.float32).T                    # (L, PRED)
    trend_w = ma_mat @ reg_wT                                          # folded
    reg_b_row = np.asarray(raw["reg_b"], np.float32).reshape(1, PRED_LEN)

    # ReplicationPad1d((0, stride)) + unfold(patch_len, stride) + W_P folded
    # into one (L, PATCH_NUM * D_MODEL) matrix with pn-major columns.
    wp = np.asarray(raw["wp"], np.float32)                             # (PL, D)
    wp_fold = np.zeros((SEQ_LEN, PATCH_NUM * D_MODEL), np.float32)
    for i in range(PATCH_NUM):
        for j in range(PATCH_LEN):
            src = min(i * STRIDE + j, SEQ_LEN - 1)                     # end replication
            wp_fold[src, i * D_MODEL:(i + 1) * D_MODEL] += wp[j]

    # W_P bias + positional encoding (dropout identity), pn-major flatten
    biaspos = (np.asarray(raw["w_pos"], np.float32)
               + np.asarray(raw["bp"], np.float32).reshape(1, D_MODEL))
    biaspos_row = biaspos.reshape(1, PATCH_NUM * D_MODEL)

    # Flatten_Head weight is stored d-major (row index = d*PATCH_NUM + pn, the
    # PyTorch flatten(-2) of permuted (D, PN)); re-permute to pn-major rows so
    # it composes with the pn-major wp_fold flatten order.
    hw = np.asarray(raw["head_w"], np.float32)                         # (NF, PRED)
    head_w2 = (hw.reshape(D_MODEL, PATCH_NUM, PRED_LEN)
                 .transpose(1, 0, 2).reshape(HEAD_NF, PRED_LEN))
    head_b_row = np.asarray(raw["head_b"], np.float32).reshape(1, PRED_LEN)

    # offline fold of patch-embedding + identity encoder + head
    w_comb = wp_fold @ head_w2                                         # (L, PRED)
    b_comb = biaspos_row @ head_w2 + head_b_row                        # (1, PRED)

    # --- packed weight slab: [ma_mat | trend_w | w_comb] --------------------
    w_slab = np.concatenate([ma_mat, trend_w, w_comb], axis=1).astype(np.float32)

    # --- packed per-row constants slab ---------------------------------------
    # row index = b*C + c, so channel params are tiled over batch
    rw = np.asarray(raw["revin_w"], np.float32).reshape(DEC_IN)
    rb = np.asarray(raw["revin_b"], np.float32).reshape(DEC_IN)
    rw_col = np.tile(rw, B).reshape(BC, 1)
    rb_col = np.tile(rb, B).reshape(BC, 1)
    rinv_col = 1.0 / (rw_col + EPS * EPS)                              # denorm recip
    c_slab = np.concatenate([
        np.broadcast_to(reg_b_row, (BC, PRED_LEN)),
        np.broadcast_to(b_comb, (BC, PRED_LEN)),
        rw_col, rb_col, rinv_col], axis=1).astype(np.float32)
    assert c_slab.shape == (BC, C_WIDTH)
    assert w_slab.shape == (SEQ_LEN, W_WC_HI)

    return {"w_slab": jnp.asarray(w_slab), "c_slab": jnp.asarray(c_slab)}


# --------------------------- full forward (glue) -----------------------------
def micn_forward(x_enc, x_mark_enc, x_dec, x_mark_dec, params):
    del x_mark_enc, x_mark_dec            # unused in the reference 'regre' forward
    n_vars = x_dec.shape[2]

    # boundary layout glue: (B, L, C) -> (B*C, L) rows, time lane-dense
    # (kept as an XLA transpose fused inside the same jit; at these sizes the
    #  in-kernel einshape re-layout is not worth the lowering complexity)
    x_rows = jnp.transpose(x_enc, (0, 2, 1)).reshape(B * n_vars, SEQ_LEN)

    vmem = pl.BlockSpec(memory_space=pltpu.MemorySpace.VMEM)
    out_rows = pl.pallas_call(
        micn_fused_kernel,
        out_shape=jax.ShapeDtypeStruct((B * n_vars, PRED_LEN), F32),
        in_specs=[vmem, vmem, vmem],
        out_specs=vmem,
    )(x_rows, params["w_slab"], params["c_slab"])

    # (B*C, PRED_LEN) -> (B, PRED_LEN, C)
    return jnp.transpose(out_rows.reshape(B, n_vars, PRED_LEN), (0, 2, 1))


# ----------------------------------- main ------------------------------------
if __name__ == "__main__":
    key = jax.random.PRNGKey(0)
    k_in, k_dec, k_rb, k_wp, k_pos, k_hw = jax.random.split(key, 6)

    # inputs (x_mark_* / x_dec only shape-used in the reference forward)
    x_enc = jax.random.normal(k_in, (B, SEQ_LEN, DEC_IN), dtype=F32)
    x_mark_enc = jnp.zeros((B, SEQ_LEN, 4), dtype=F32)
    x_dec = jax.random.normal(k_dec, (B, LABEL_LEN + PRED_LEN, DEC_IN), dtype=F32)
    x_mark_dec = jnp.zeros((B, LABEL_LEN + PRED_LEN, 4), dtype=F32)

    # deterministic parameter init (shapes per the module __init__)
    raw_params = {
        # regression: weight fixed to 1/out_len ones (as in the module)
        "reg_w": jnp.full((PRED_LEN, SEQ_LEN), 1.0 / PRED_LEN, dtype=F32),
        "reg_b": (jax.random.uniform(k_rb, (PRED_LEN, 1), minval=-1.0, maxval=1.0)
                  / jnp.sqrt(SEQ_LEN)).astype(F32),
        # W_P: Linear(patch_len, d_model), stored as W^T
        "wp": (0.02 * jax.random.normal(k_wp, (PATCH_LEN, D_MODEL))).astype(F32),
        "bp": jnp.zeros((1, D_MODEL), dtype=F32),
        # positional encoding pe='zeros' -> uniform(-0.02, 0.02)
        "w_pos": jax.random.uniform(k_pos, (PATCH_NUM, D_MODEL),
                                    minval=-0.02, maxval=0.02).astype(F32),
        # Flatten_Head: Linear(d_model*patch_num, pred_len), stored as W^T
        # with the PyTorch d-major flatten order for the input features.
        "head_w": (0.02 * jax.random.normal(k_hw, (HEAD_NF, PRED_LEN))).astype(F32),
        "head_b": jnp.zeros((1, PRED_LEN), dtype=F32),
        # RevIN affine params (init: ones / zeros)
        "revin_w": jnp.ones((1, DEC_IN), dtype=F32),
        "revin_b": jnp.zeros((1, DEC_IN), dtype=F32),
    }
    params = prepare_params(raw_params)

    fwd = jax.jit(lambda a, b, c, d: micn_forward(a, b, c, d, params))
    out = fwd(x_enc, x_mark_enc, x_dec, x_mark_dec)
    out = jax.block_until_ready(out)

    assert out.shape == (B, PRED_LEN, DEC_IN)
    assert bool(jnp.all(jnp.isfinite(out)))
    print("KERNEL_OK")
</pallas_src>

<mosaic_0001>
module attributes {stable_mosaic.version = 11 : i64} {
  func.func @micn_fused_kernel(%arg0: memref<8x16xf32, #tpu.memory_space<vmem>>, %arg1: memref<16x32xf32, #tpu.memory_space<vmem>>, %arg2: memref<8x19xf32, #tpu.memory_space<vmem>>, %arg3: memref<8x8xf32, #tpu.memory_space<vmem>>) attributes {dimension_semantics = [], scalar_prefetch = 0 : i64, scratch_operands = 0 : i64, tpu.core_type = #tpu.core_type<tc>} {
    %c0 = arith.constant 0 : index
    %c0_0 = arith.constant 0 : index
    %0 = vector.load %arg0[%c0, %c0_0] : memref<8x16xf32, #tpu.memory_space<vmem>>, vector<8x16xf32>
    %c0_1 = arith.constant 0 : index
    %c0_2 = arith.constant 0 : index
    %1 = vector.load %arg1[%c0_1, %c0_2] : memref<16x32xf32, #tpu.memory_space<vmem>>, vector<16x24xf32>
    %cst = arith.constant dense<0.000000e+00> : vector<8x24xf32>
    %2 = tpu.matmul %0, %1, %cst {dimension_numbers = #tpu.dot_dimension_numbers<[1], [0], [0], [1], [0, 0, 1, 1], [], []>} : vector<8x16xf32>, vector<16x24xf32>, vector<8x24xf32> -> vector<8x24xf32>
    %3 = vector.extract_strided_slice %2 {offsets = [0, 0], sizes = [8, 16], strides = [1, 1]} : vector<8x24xf32> to vector<8x16xf32>
    %4 = vector.extract_strided_slice %2 {offsets = [0, 16], sizes = [8, 8], strides = [1, 1]} : vector<8x24xf32> to vector<8x8xf32>
    %c0_3 = arith.constant 0 : index
    %c0_4 = arith.constant 0 : index
    %5 = vector.load %arg2[%c0_3, %c0_4] : memref<8x19xf32, #tpu.memory_space<vmem>>, vector<8x8xf32>
    %6 = arith.addf %4, %5 : vector<8x8xf32>
    %7 = arith.subf %0, %3 : vector<8x16xf32>
    %8 = vector.extract_strided_slice %7 {offsets = [0, 15], sizes = [8, 1], strides = [1, 1]} : vector<8x16xf32> to vector<8x1xf32>
    %cst_5 = arith.constant dense<0.000000e+00> : vector<8xf32>
    %9 = vector.multi_reduction <add>, %7, %cst_5 [1] : vector<8x16xf32> to vector<8xf32>
    %10 = vector.shape_cast %9 : vector<8xf32> to vector<8x1xf32>
    %cst_6 = arith.constant 1.600000e+01 : f32
    %11 = vector.broadcast %cst_6 : f32 to vector<8x1xf32>
    %12 = arith.divf %10, %11 : vector<8x1xf32>
    %13 = vector.broadcast %12 : vector<8x1xf32> to vector<8x16xf32>
    %14 = arith.subf %7, %13 : vector<8x16xf32>
    %15 = arith.mulf %14, %14 : vector<8x16xf32>
    %cst_7 = arith.constant dense<0.000000e+00> : vector<8xf32>
    %16 = vector.multi_reduction <add>, %15, %cst_7 [1] : vector<8x16xf32> to vector<8xf32>
    %17 = vector.shape_cast %16 : vector<8xf32> to vector<8x1xf32>
    %cst_8 = arith.constant 1.600000e+01 : f32
    %18 = vector.broadcast %cst_8 : f32 to vector<8x1xf32>
    %19 = arith.divf %17, %18 : vector<8x1xf32>
    %cst_9 = arith.constant 9.99999974E-6 : f32
    %20 = vector.broadcast %cst_9 : f32 to vector<8x1xf32>
    %21 = arith.addf %19, %20 : vector<8x1xf32>
    %22 = math.rsqrt %21 : vector<8x1xf32>
    %cst_10 = arith.constant 9.99999974E-6 : f32
    %23 = vector.broadcast %cst_10 : f32 to vector<8x1xf32>
    %24 = arith.addf %19, %23 : vector<8x1xf32>
    %25 = arith.mulf %24, %22 : vector<8x1xf32>
    %c0_11 = arith.constant 0 : index
    %c16 = arith.constant 16 : index
    %26 = vector.load %arg2[%c0_11, %c16] : memref<8x19xf32, #tpu.memory_space<vmem>>, vector<8x1xf32>
    %c0_12 = arith.constant 0 : index
    %c17 = arith.constant 17 : index
    %27 = vector.load %arg2[%c0_12, %c17] : memref<8x19xf32, #tpu.memory_space<vmem>>, vector<8x1xf32>
    %c0_13 = arith.constant 0 : index
    %c18 = arith.constant 18 : index
    %28 = vector.load %arg2[%c0_13, %c18] : memref<8x19xf32, #tpu.memory_space<vmem>>, vector<8x1xf32>
    %29 = vector.broadcast %8 : vector<8x1xf32> to vector<8x16xf32>
    %30 = arith.subf %7, %29 : vector<8x16xf32>
    %31 = vector.broadcast %22 : vector<8x1xf32> to vector<8x16xf32>
    %32 = arith.mulf %30, %31 : vector<8x16xf32>
    %33 = vector.broadcast %26 : vector<8x1xf32> to vector<8x16xf32>
    %34 = arith.mulf %32, %33 : vector<8x16xf32>
    %35 = vector.broadcast %27 : vector<8x1xf32> to vector<8x16xf32>
    %36 = arith.addf %34, %35 : vector<8x16xf32>
    %c0_14 = arith.constant 0 : index
    %c24 = arith.constant 24 : index
    %37 = vector.load %arg1[%c0_14, %c24] : memref<16x32xf32, #tpu.memory_space<vmem>>, vector<16x8xf32>
    %cst_15 = arith.constant dense<0.000000e+00> : vector<8x8xf32>
    %38 = tpu.matmul %36, %37, %cst_15 {dimension_numbers = #tpu.dot_dimension_numbers<[1], [0], [0], [1], [0, 0, 1, 1], [], []>} : vector<8x16xf32>, vector<16x8xf32>, vector<8x8xf32> -> vector<8x8xf32>
    %c0_16 = arith.constant 0 : index
    %c8 = arith.constant 8 : index
    %39 = vector.load %arg2[%c0_16, %c8] : memref<8x19xf32, #tpu.memory_space<vmem>>, vector<8x8xf32>
    %40 = arith.addf %38, %39 : vector<8x8xf32>
    %41 = vector.broadcast %27 : vector<8x1xf32> to vector<8x8xf32>
    %42 = arith.subf %40, %41 : vector<8x8xf32>
    %43 = vector.broadcast %28 : vector<8x1xf32> to vector<8x8xf32>
    %44 = arith.mulf %42, %43 : vector<8x8xf32>
    %45 = vector.broadcast %25 : vector<8x1xf32> to vector<8x8xf32>
    %46 = arith.mulf %44, %45 : vector<8x8xf32>
    %47 = vector.broadcast %8 : vector<8x1xf32> to vector<8x8xf32>
    %48 = arith.addf %46, %47 : vector<8x8xf32>
    %49 = arith.addf %48, %6 : vector<8x8xf32>
    %c0_17 = arith.constant 0 : index
    %c0_18 = arith.constant 0 : index
    %50 = vector.load %arg3[%c0_17, %c0_18] : memref<8x8xf32, #tpu.memory_space<vmem>>, vector<8x8xf32>
    tpu.vector_store %arg3[%c0_17, %c0_18], %49 {strides = array<i32>} : memref<8x8xf32, #tpu.memory_space<vmem>>, vector<8x8xf32>,
    return
  }
}

</mosaic_0001>

<bundles_post_ra>
// kernel: _lambda_.1
= control target key start
LH: loop header
LB: loop body
LE: loop exit
PB: predicated region body
PF: predicated region fallthrough
CT: control target
= control target key end

     0   :  { %8 = vsyncpa [#allocation3], 0  ;;  %s485_s0 = inlined_call_operand.hbm [shape: f32[8,16], index: 0, kind: input, shape index: {}]   ;;  %s486_s1 = inlined_call_operand.hbm [shape: f32[16,32], index: 1, kind: input, shape index: {}]   ;;  %s487_s2 = inlined_call_operand.vmem [shape: f32[8,19], index: 2, kind: input, shape index: {}]   ;;  %s488_s3 = inlined_call_operand.hbm [shape: f32[8,8], index: 3, kind: output, shape index: {}]  }
   0x1   :  { %9 = vsyncpa [#allocation6], 0 }
   0x2   :  { %10 = vsyncpa [#allocation4], 0  ;;  %s399_s12 = smov [#allocation2]   ;;  %s400_s14 = smov [#allocation5]  }
   0x3   :  { %s17_s13 = sshll.u32 %s399_s12, 4  ;;  %s26_s15 = sshll.u32 %s400_s14, 4  ;;  %s18_s13 = int_to_ptr.vmem [resolvable:$true] %s17_s13  ;;  %s435_s15 = int_to_ptr.vmem [resolvable:$true] %s26_s15 }
   0x4   :  { %s327_s18 = scalar_lea.hbm %s485_s0, 128 }
   0x5   :  { %p328_p0 = scmp.ne.s32.totalorder %s485_s0, %s327_s18  ;;  %p331_p1 = scmp.lt.u32.totalorder %s327_s18, %s485_s0 }
   0x7   :  { %p333_p2 = pnand %p331_p1, %p328_p0 }
   0x9   :  { %336 = shalt.err (!%p333_p2)
}
   0xa   :  { %s337_s23 = scalar_lea.vmem %s18_s13, 128  ;;  %p342_p4 = scmp.lt.s32.totalorder %s18_s13, %s18_s13 }
   0xb   :  { %p338_p3 = scmp.ne.s32.totalorder %s18_s13, %s337_s23  ;;  %p343_p5 = scmp.lt.s32.totalorder %s337_s23, %s337_s23 }
   0xd   :  { %p344_p6 = por %p343_p5, %p342_p4 }
   0xf   :  { %p345_p7 = pnand %p344_p6, %p338_p3 }
  0x11   :  { %348 = shalt.err (!%p345_p7)
}
  0x12   :  { %20 = dma.hbm_to_vmem [thread:$0]  %s485_s0, 128, %s18_s13, [#allocation3]  }
  0x13   :  { %s349_s28 = scalar_lea.hbm %s486_s1, 256 }
  0x14   :  { %p350_p8 = scmp.ne.s32.totalorder %s486_s1, %s349_s28  ;;  %p353_p9 = scmp.lt.u32.totalorder %s349_s28, %s486_s1 }
  0x16   :  { %p355_p10 = pnand %p353_p9, %p350_p8 }
  0x18   :  { %358 = shalt.err (!%p355_p10)
}
  0x19   :  { %s359_s6 = scalar_lea.vmem %s435_s15, 256  ;;  %p364_p12 = scmp.lt.s32.totalorder %s435_s15, %s435_s15 }
  0x1a   :  { %p360_p11 = scmp.ne.s32.totalorder %s435_s15, %s359_s6  ;;  %p365_p13 = scmp.lt.s32.totalorder %s359_s6, %s359_s6 }
  0x1c   :  { %p366_p0 = por %p365_p13, %p364_p12 }
  0x1e   :  { %p367_p1 = pnand %p366_p0, %p360_p11 }
  0x20   :  { %370 = shalt.err (!%p367_p1)
}
  0x21   :  { %s401_s0 = smov 128   ;;  %s402_s7 = smov 8  }
  0x22   :  { %32 = dma.hbm_to_vmem [thread:$0]  %s486_s1, 256, %s435_s15, [#allocation6], %s401_s0, %s401_s0, %s402_s7  }
  0x23   :  { %393 = dma.done.wait [#allocation3], 128  }
  0x24   :  { %394 = vsyncadd [#allocation3], 4294967168 }
  0x25   :  { %395 = dma.done.wait [#allocation6], 256  }
  0x26   :  { %396 = vsyncadd [#allocation6], 4294967040  ;;  %v403_v0 = vmov 0.0|0.0   ;;  %vm404_vm0 = vmmov 0   ;;  %v405_v1 = vmov 0.0   ;;  %v42_v2 = vld [vmem:[#allocation5] sm:$0xff] }
  0x27   :  { %293 = vmatprep.subr.bf16.mxu0 %v403_v0  ;;  %283 = vmatprep.mubr.msk.f32.mxu0 %vm404_vm0, %v405_v1  ;;  %v43_v3 = vld [vmem:[#allocation5 + $0x8] sm:$0xff]  ;;  %v41_v6 = vld [vmem:[#allocation2] sm:$0xff]  ;;  %vm44_vm1 = vcmask 130048   ;;  %v406_v7 = vmov 15   ;;  %v407_v13 = vmov 16   ;;  %s408_s11 = smov 104  }
  0x28   :  { %296 = vmatprep.subr.bf16.mxu1 %v403_v0  ;;  %290 = vmatprep.mubr.msk.f32.mxu1 %vm404_vm0, %v405_v1  ;;  %v318_v4 = vpack.i.bf16 %v43_v3, %v42_v2  ;;  %v294_v5 = vpack.c.bf16 %v43_v3, %v42_v2  ;;  %v118_v12 = vld [vmem:[%s487_s2] sm:$0xff]  ;;  %v409_v14 = vmov 18   ;;  %s410_s12 = smov 16   ;;  %s411_s13 = smov 120   ;;  %v412_v15 = vmov 17  }
  0x29   :  { %315 = vset.pattern.permute.xlu1 %v406_v7  ;;  %317 = vset.pattern.permute.xlu0 %v412_v15  ;;  %s413_s2 = smov 112   ;;  %s414_s14 = smov [#allocation7]   ;;  %vm253_vm2 = vcmask 64512  }
  0x2a   :  { %295 = vmatpush3.bf16.msra.mxu0 %v294_v5  ;;  %s261_s15 = sshll.u32 %s414_s14, 4  ;;  %s262_s15 = int_to_ptr.vmem [resolvable:$true] %s261_s15 }
  0x2b   :  { %s371_s16 = scalar_lea.vmem %s262_s15, 128  ;;  %p376_p3 = scmp.lt.s32.totalorder %s262_s15, %s262_s15 }
  0x2c   :  { %p372_p2 = scmp.ne.s32.totalorder %s262_s15, %s371_s16  ;;  %p377_p4 = scmp.lt.s32.totalorder %s371_s16, %s371_s16 }
  0x2d   :  { %284 = vmatmul.mubr.msk.f32.vlgmr.msra.gmra.mrb[0].mxu0 %vm44_vm1, %v41_v6 }
  0x2e   :  { %p378_p5 = por %p377_p4, %p376_p3 }
  0x30   :  { %p379_p6 = pnand %p378_p5, %p372_p2 }
 0x100   :  { %v114_v8 = vpop.f32.mrb[0].mxu0 }
 0x101   :  { %v124_v9 = vsub.f32 %v41_v6, %v114_v8  ;;  %v285_v10 = vpop.f32.mrb[1].mxu0 }
 0x103   :  { %141 = vperm.xlu1 %315, %v124_v9   ;;  %v125_v11 = vsel %vm44_vm1, %v124_v9, 0.0 }
 0x104   :  { %126 = vadd.xlane.f32.xlu0 %v125_v11 }
 0x107   :  { %316 = vset.pattern.permute.xlu1 %v407_v13 }
 0x108   :  { %147 = vperm.xlu1 %316, %v118_v12  }
 0x10c   :  { %319 = vrot.lane.b32.xlu1 %v318_v4, %s408_s11 }
 0x10d   :  { %323 = vset.pattern.permute.xlu1 %v409_v14 }
 0x110   :  { %120 = vrot.lane.b32.xlu1 %v118_v12, %s410_s12 }
 0x114   :  { %242 = vperm.xlu1 %323, %v118_v12  }
 0x118   :  { %164 = vrot.lane.b32.xlu1 %v118_v12, %s411_s13 }
 0x182   :  { %v142_v16 = vpop.permute.xlu1 %141 }
 0x183   :  { %v144_v32 = vsub.f32 %v124_v9, %v142_v16 }
 0x187   :  { %v148_v17 = vpop.permute.xlu1 %147 }
 0x18b   :  { %v320_v18 = vpop.permute.xlu1 %319 }
 0x18c   :  { %v322_v26 = vunpack.i.h.bf16 %v320_v18  ;;  %v321_v27 = vunpack.i.l.bf16 %v320_v18 }
 0x18e   :  { %v297_v28 = vpack.c.bf16 %v322_v26, %v321_v27 }
 0x18f   :  { %v121_v19 = vpop.permute.xlu1 %120 }
 0x190   :  { %v123_v20 = vadd.f32 %v121_v19, %v114_v8  ;;  %298 = vmatpush3.bf16.msra.mxu1 %v297_v28 }
 0x191   :  { %v127_v21 = vpop.xlane.xlu0 %126 }
 0x192   :  { %v129_v22 = vmul.f32 0.0625, %v127_v21  ;;  %249 = vrot.lane.b32.xlu1 %v123_v20, %s413_s2 }
 0x193   :  { %v243_v39 = vpop.permute.xlu1 %242 }
 0x194   :  { %v130_v23 = vsub.f32 %v124_v9, %v129_v22 }
 0x196   :  { %v131_v24 = vmul.f32 %v130_v23, %v130_v23 }
 0x197   :  { %v165_v40 = vpop.permute.xlu1 %164 }
 0x198   :  { %v132_v25 = vsel %vm44_vm1, %v131_v24, 0.0 }
 0x199   :  { %133 = vadd.xlane.f32.xlu0 %v132_v25 }
 0x1af   :  { %152 = vperm.xlu0 %317, %v118_v12  }
 0x1b3   :  { %324 = vset.pattern.permute.xlu0 %v409_v14 }
 0x204   :  { %v250_v48 = vpop.permute.xlu1 %249 }
 0x226   :  { %v134_v29 = vpop.xlane.xlu0 %133 }
 0x227   :  { %v135_v30 = vmul.f32 0.0625, %v134_v29 }
 0x229   :  { %v136_v31 = vadd.f32 1e-05, %v135_v30 }
 0x22b   :  { %325 = vrsqrt.f32 %v136_v31 }
 0x22e   :  { %v153_v36 = vpop.permute.xlu0 %152 }
 0x235   :  { %v326_v33 = vpop.eup %325 }
 0x236   :  { %v138_v34 = vmul.f32 %v326_v33, %v136_v31  ;;  %v145_v35 = vmul.f32 %v326_v33, %v144_v32 }
 0x238   :  { %v150_v37 = vmul.f32 %v148_v17, %v145_v35 }
 0x23a   :  { %v155_v38 = vadd.f32 %v153_v36, %v150_v37 }
 0x23c   :  { %291 = vmatmul.mubr.msk.f32.vlgmr.msra.gmra.mrb[0].mxu1 %vm44_vm1, %v155_v38 }
 0x30f   :  { %v236_v41 = vpop.f32.mrb[0].mxu1 }
 0x310   :  { %v237_v42 = vadd.f32 %v236_v41, %v165_v40  ;;  %v292_v43 = vpop.f32.mrb[1].mxu1 }
 0x312   :  { %v240_v44 = vsub.f32 %v237_v42, %v153_v36 }
 0x314   :  { %v245_v45 = vmul.f32 %v243_v39, %v240_v44 }
 0x316   :  { %v246_v46 = vmul.f32 %v245_v45, %v138_v34 }
 0x318   :  { %v247_v47 = vadd.f32 %v246_v46, %v142_v16 }
 0x31a   :  { %v252_v49 = vadd.f32 %v250_v48, %v247_v47 }
 0x31c   :  { %254 = vst.msk [vmem:[#allocation7] sm:$0xff] %vm253_vm2, %v252_v49 }
 0x31d   :  { %382 = shalt.err (!%p379_p6)
}
 0x31e   :  { %s383_s19 = scalar_lea.hbm %s488_s3, 128 }
 0x31f   :  { %p384_p7 = scmp.ne.s32.totalorder %s488_s3, %s383_s19  ;;  %p387_p8 = scmp.lt.u32.totalorder %s383_s19, %s488_s3 }
 0x321   :  { %p389_p9 = pnand %p387_p8, %p384_p7 }
 0x323   :  { %392 = shalt.err (!%p389_p9)
}
 0x324   :  { %264 = dma.vmem_to_hbm [thread:$0]  %s262_s15, 128, %s488_s3, [#allocation4]  }
 0x325   :  { %397 = dma.done.wait [#allocation4], 128  }
 0x326   :  { %398 = vsyncadd [#allocation4], 4294967168 }
 0x327   :  { %268 = vsyncpa [#allocation3], 1 }
 0x328   :  { %269 = vsyncpa [#allocation6], 1 }
 0x329   :  { %270 = vsyncpa [#allocation4], 1 }

</bundles_post_ra>
